<compile_context>
chip_gen: v7x
topology: tpu7x:2x2x1
jax: 0.10.0
libtpu: 0.0.40
codegen_flags: <defaults>
</compile_context>

<pallas_src>
import jax
import jax.numpy as jnp
from jax import lax
from jax.experimental import pallas as pl
from jax.experimental.pallas import tpu as pltpu

N_FACTORS = 100         # matches `n_factors = 100` in the PyTorch module
TB = 128                # batch rows per grid step (one lane-dense output row)
LANES = 128             # padded factor width (full vreg lane width)
ONEHOT_MAX_ROWS = 2048  # use the MXU one-hot gather when both tables are this small


def prepare_factors(user_factors, anime_factors):
    """One-time model setup: cast to f32 and zero-pad the factor axis to a full
    vreg lane width (zeros don't change the dot product).  Hoisted out of the
    per-call forward so the padded-table copy doesn't hit HBM on every call."""
    def _pad(t):
        n, f = t.shape
        f_pad = ((f + LANES - 1) // LANES) * LANES
        return jnp.pad(t.astype(jnp.float32), ((0, 0), (0, f_pad - f)))
    return _pad(user_factors), _pad(anime_factors)


def _mf_gather_kernel(user_idx_ref, anime_idx_ref, uf_ref, af_ref, out_ref,
                      prod_tile):
    # user_idx_ref / anime_idx_ref : SMEM int32 (padded_batch,) -- scalar prefetch
    # uf_ref / af_ref : VMEM-resident tables (n_rows, nf_pad)
    # out_ref         : VMEM (1, TB) lane-dense output row
    # prod_tile       : VMEM (TB, nf_pad) fused gather*multiply scratch
    base = pl.program_id(0) * TB

    def gather(i, carry):
        uid = user_idx_ref[base + i]
        aid = anime_idx_ref[base + i]
        # Fused multiply-into-gather: one sublane store per row instead of two,
        # and no re-load of separate u/a tiles afterwards.
        prod_tile[pl.ds(i, 1), :] = (uf_ref[pl.ds(uid, 1), :] *
                                     af_ref[pl.ds(aid, 1), :])
        return carry

    # Body is now 2 vld + 1 vmul + 1 vst + 2 sld; deeper unroll lets the LLO
    # scheduler hide the scalar index loads under the load/store stream.
    lax.fori_loop(0, TB, gather, 0, unroll=16)

    # One lane reduce for the whole tile, stored as one unmasked 128-lane row.
    out_ref[...] = jnp.sum(prod_tile[...], axis=-1).reshape(1, TB)


def _mf_onehot_kernel(uidx_ref, aidx_ref, uf_ref, af_ref, out_ref):
    # uidx_ref / aidx_ref : VMEM (TB, 1) int32 index columns for this block
    # uf_ref / af_ref     : VMEM-resident tables (n_rows, nf_pad)
    n_users = uf_ref.shape[0]
    n_anime = af_ref.shape[0]
    oh_u = (lax.broadcasted_iota(jnp.int32, (TB, n_users), 1)
            == uidx_ref[...]).astype(jnp.float32)
    oh_a = (lax.broadcasted_iota(jnp.int32, (TB, n_anime), 1)
            == aidx_ref[...]).astype(jnp.float32)
    # Two small MXU matmuls gather all TB rows at once instead of 128
    # serialized sublane copies (the MXU is otherwise idle in this kernel).
    gu = jnp.dot(oh_u, uf_ref[...], preferred_element_type=jnp.float32)
    ga = jnp.dot(oh_a, af_ref[...], preferred_element_type=jnp.float32)
    out_ref[...] = jnp.sum(gu * ga, axis=-1).reshape(1, TB)


def _vmem_capacity_bytes():
    try:
        return int(pltpu.get_tpu_info().vmem_capacity_bytes)
    except Exception:
        return 64 << 20   # conservative fallback: v7x per-TensorCore VMEM


def matrix_factorization_forward(user, anime, uf_padded, af_padded, *,
                                 use_onehot=None):
    """user, anime: (batch,) int indices.  uf_padded / af_padded: outputs of
    prepare_factors() (f32, factor axis padded to a multiple of 128).
    Returns (batch,) f32 == (user_factors[user] * anime_factors[anime]).sum(1)."""
    batch = user.shape[0]
    n_users, nf_pad = uf_padded.shape
    n_anime, nf_pad2 = af_padded.shape
    assert nf_pad == nf_pad2 and nf_pad % LANES == 0, "call prepare_factors() first"

    # Clamp indices: out-of-range VMEM reads inside the kernel are unchecked.
    # (PyTorch would raise on OOB embedding ids; here they map to valid rows.)
    uidx = jnp.clip(user.astype(jnp.int32), 0, n_users - 1)
    aidx = jnp.clip(anime.astype(jnp.int32), 0, n_anime - 1)

    # Pad batch to a multiple of TB (padded rows look up row 0; sliced off below).
    padded_batch = ((batch + TB - 1) // TB) * TB
    if padded_batch != batch:
        uidx = jnp.pad(uidx, (0, padded_batch - batch))
        aidx = jnp.pad(aidx, (0, padded_batch - batch))
    n_blocks = padded_batch // TB

    # VMEM budget: single-buffered resident tables + product scratch + tiny
    # (double-buffered) index/output blocks + compiler headroom.
    table_bytes = (n_users + n_anime) * nf_pad * 4
    scratch_bytes = TB * nf_pad * 4
    io_bytes = 2 * (TB * 4) + 2 * (2 * TB * 4)
    need = table_bytes + scratch_bytes + io_bytes + (8 << 20)
    cap = _vmem_capacity_bytes()
    if need > cap:
        # TODO(synk): for tables too large to stay VMEM-resident (esp. v7x's
        # 64 MiB/TC), switch uf/af to pl.BlockSpec(memory_space=pl.ANY) and
        # DMA-gather only the TB referenced rows per step (double-buffered,
        # prefetching block b+1's rows while block b computes).
        raise NotImplementedError(
            f"factor tables need ~{need >> 20} MiB VMEM but only {cap >> 20} MiB "
            "is available; large-table DMA-gather path not implemented")
    vmem_limit = int(min(max(need, 32 << 20), cap))

    if use_onehot is None:
        use_onehot = (n_users <= ONEHOT_MAX_ROWS and n_anime <= ONEHOT_MAX_ROWS)

    # Resident factor tables: memory-space-only spec -> whole table in VMEM,
    # constant across the grid (no per-step re-copy / double-buffer pair).
    table_spec = pl.BlockSpec(memory_space=pltpu.MemorySpace.VMEM)
    compiler_params = pltpu.CompilerParams(
        dimension_semantics=("parallel",),   # batch blocks shard across TCs (v7x)
        vmem_limit_bytes=vmem_limit)
    out_shape = jax.ShapeDtypeStruct((n_blocks, TB), jnp.float32)

    if use_onehot:
        # Small-vocabulary path: one-hot masks + MXU matmuls; per-block index
        # columns arrive as (TB, 1) VMEM tiles (no full-batch SMEM residency).
        out = pl.pallas_call(
            _mf_onehot_kernel,
            out_shape=out_shape,
            grid_spec=pltpu.PrefetchScalarGridSpec(
                num_scalar_prefetch=0,
                grid=(n_blocks,),
                in_specs=[
                    pl.BlockSpec((TB, 1), lambda b: (b, 0)),
                    pl.BlockSpec((TB, 1), lambda b: (b, 0)),
                    table_spec,
                    table_spec,
                ],
                out_specs=pl.BlockSpec((1, TB), lambda b: (b, 0)),
            ),
            compiler_params=compiler_params,
        )(uidx.reshape(padded_batch, 1), aidx.reshape(padded_batch, 1),
          uf_padded, af_padded)
    else:
        # Large-vocabulary path: row gather with the multiply fused into the
        # gather loop.  Indices are scalar-prefetched into SMEM (4 B per row --
        # fine up to ~10^5 rows per call).
        out = pl.pallas_call(
            _mf_gather_kernel,
            out_shape=out_shape,
            grid_spec=pltpu.PrefetchScalarGridSpec(
                num_scalar_prefetch=2,            # user idx, anime idx -> SMEM
                grid=(n_blocks,),
                in_specs=[table_spec, table_spec],
                out_specs=pl.BlockSpec((1, TB), lambda b, u, a: (b, 0)),
                scratch_shapes=[pltpu.VMEM((TB, nf_pad), jnp.float32)],
            ),
            compiler_params=compiler_params,
        )(uidx, aidx, uf_padded, af_padded)

    return out.reshape(-1)[:batch]


if __name__ == "__main__":
    key = jax.random.PRNGKey(0)
    n_users, n_anime, batch = 64, 48, 16
    k1, k2, k3, k4 = jax.random.split(key, 4)

    # nn.Embedding default init ~ N(0, 1); deterministic synthetic weights.
    user_factors = jax.random.normal(k1, (n_users, N_FACTORS), jnp.float32)
    anime_factors = jax.random.normal(k2, (n_anime, N_FACTORS), jnp.float32)
    user = jax.random.randint(k3, (batch,), 0, n_users, dtype=jnp.int32)
    anime = jax.random.randint(k4, (batch,), 0, n_anime, dtype=jnp.int32)

    # One-time setup (padding hoisted out of the forward path).
    uf_pad, af_pad = prepare_factors(user_factors, anime_factors)
    ref = jnp.sum(user_factors[user] * anime_factors[anime], axis=1)

    # Default dispatch: small vocabularies -> one-hot MXU path.
    out = matrix_factorization_forward(user, anime, uf_pad, af_pad)
    jax.block_until_ready(out)
    assert out.shape == (batch,)
    assert jnp.allclose(out, ref, atol=1e-4, rtol=1e-4), (out, ref)

    # Also exercise the large-vocabulary fused-gather path on the same inputs.
    out_g = matrix_factorization_forward(user, anime, uf_pad, af_pad,
                                         use_onehot=False)
    jax.block_until_ready(out_g)
    assert jnp.allclose(out_g, ref, atol=1e-4, rtol=1e-4), (out_g, ref)

    print("KERNEL_OK")
</pallas_src>

<mosaic_0001>
module attributes {stable_mosaic.version = 11 : i64} {
  func.func @_mf_onehot_kernel(%arg0: i32, %arg1: memref<128x1xi32, #tpu.memory_space<vmem>>, %arg2: memref<128x1xi32, #tpu.memory_space<vmem>>, %arg3: memref<64x128xf32, #tpu.memory_space<vmem>>, %arg4: memref<48x128xf32, #tpu.memory_space<vmem>>, %arg5: memref<1x128xf32, #tpu.memory_space<vmem>>) attributes {dimension_semantics = [#tpu.dimension_semantics<parallel>], iteration_bounds = array<i64: 1>, scalar_prefetch = 0 : i64, scratch_operands = 0 : i64, tpu.core_type = #tpu.core_type<tc>, window_params = [{transform_indices = @transform_0, window_bounds = array<i64: 128, 1>}, {transform_indices = @transform_1, window_bounds = array<i64: 128, 1>}, {pipeline_mode = #tpu.pipeline_mode<synchronous>, transform_indices = @transform_2, window_bounds = array<i64: 64, 128>}, {pipeline_mode = #tpu.pipeline_mode<synchronous>, transform_indices = @transform_3, window_bounds = array<i64: 48, 128>}, {transform_indices = @transform_4, window_bounds = array<i64: 1, 128>}]} {
    %0 = tpu.iota {dimensions = array<i32: 1>} : vector<128x64xi32>
    %c0 = arith.constant 0 : index
    %c0_0 = arith.constant 0 : index
    %1 = vector.load %arg1[%c0, %c0_0] : memref<128x1xi32, #tpu.memory_space<vmem>>, vector<128x1xi32>
    %2 = vector.broadcast %1 : vector<128x1xi32> to vector<128x64xi32>
    %3 = arith.cmpi eq, %0, %2 : vector<128x64xi32>
    %4 = arith.extui %3 : vector<128x64xi1> to vector<128x64xi32>
    %5 = arith.sitofp %4 : vector<128x64xi32> to vector<128x64xf32>
    %6 = tpu.iota {dimensions = array<i32: 1>} : vector<128x48xi32>
    %c0_1 = arith.constant 0 : index
    %c0_2 = arith.constant 0 : index
    %7 = vector.load %arg2[%c0_1, %c0_2] : memref<128x1xi32, #tpu.memory_space<vmem>>, vector<128x1xi32>
    %8 = vector.broadcast %7 : vector<128x1xi32> to vector<128x48xi32>
    %9 = arith.cmpi eq, %6, %8 : vector<128x48xi32>
    %10 = arith.extui %9 : vector<128x48xi1> to vector<128x48xi32>
    %11 = arith.sitofp %10 : vector<128x48xi32> to vector<128x48xf32>
    %c0_3 = arith.constant 0 : index
    %c0_4 = arith.constant 0 : index
    %12 = vector.load %arg3[%c0_3, %c0_4] : memref<64x128xf32, #tpu.memory_space<vmem>>, vector<64x128xf32>
    %cst = arith.constant dense<0.000000e+00> : vector<128x128xf32>
    %13 = tpu.matmul %5, %12, %cst {dimension_numbers = #tpu.dot_dimension_numbers<[1], [0], [0], [1], [0, 0, 1, 1], [], []>} : vector<128x64xf32>, vector<64x128xf32>, vector<128x128xf32> -> vector<128x128xf32>
    %c0_5 = arith.constant 0 : index
    %c0_6 = arith.constant 0 : index
    %14 = vector.load %arg4[%c0_5, %c0_6] : memref<48x128xf32, #tpu.memory_space<vmem>>, vector<48x128xf32>
    %cst_7 = arith.constant dense<0.000000e+00> : vector<128x128xf32>
    %15 = tpu.matmul %11, %14, %cst_7 {dimension_numbers = #tpu.dot_dimension_numbers<[1], [0], [0], [1], [0, 0, 1, 1], [], []>} : vector<128x48xf32>, vector<48x128xf32>, vector<128x128xf32> -> vector<128x128xf32>
    %16 = arith.mulf %13, %15 : vector<128x128xf32>
    %cst_8 = arith.constant dense<0.000000e+00> : vector<128xf32>
    %17 = vector.multi_reduction <add>, %16, %cst_8 [1] : vector<128x128xf32> to vector<128xf32>
    %18 = vector.shape_cast %17 : vector<128xf32> to vector<1x128xf32>
    %c0_9 = arith.constant 0 : index
    %c0_10 = arith.constant 0 : index
    %19 = vector.load %arg5[%c0_9, %c0_10] : memref<1x128xf32, #tpu.memory_space<vmem>>, vector<1x128xf32>
    tpu.vector_store %arg5[%c0_9, %c0_10], %18 {strides = array<i32>} : memref<1x128xf32, #tpu.memory_space<vmem>>, vector<1x128xf32>,
    return
  }
  func.func @transform_0(%arg0: i32) -> (i32, i32) {
    %c0_i32 = arith.constant 0 : i32
    %c0_i32_0 = arith.constant 0 : i32
    return %arg0, %c0_i32 : i32, i32
  }
  func.func @transform_1(%arg0: i32) -> (i32, i32) {
    %c0_i32 = arith.constant 0 : i32
    %c0_i32_0 = arith.constant 0 : i32
    return %arg0, %c0_i32 : i32, i32
  }
  func.func @transform_2(%arg0: i32) -> (i32, i32) {
    %c0_i32 = arith.constant 0 : i32
    %c0_i32_0 = arith.constant 0 : i32
    %c0_i32_1 = arith.constant 0 : i32
    return %c0_i32, %c0_i32_0 : i32, i32
  }
  func.func @transform_3(%arg0: i32) -> (i32, i32) {
    %c0_i32 = arith.constant 0 : i32
    %c0_i32_0 = arith.constant 0 : i32
    %c0_i32_1 = arith.constant 0 : i32
    return %c0_i32, %c0_i32_0 : i32, i32
  }
  func.func @transform_4(%arg0: i32) -> (i32, i32) {
    %c0_i32 = arith.constant 0 : i32
    %c0_i32_0 = arith.constant 0 : i32
    return %arg0, %c0_i32 : i32, i32
  }
}

</mosaic_0001>

<bundles_post_ra>
// kernel: tpu_custom_call.1
= control target key start
LH: loop header
LB: loop body
LE: loop exit
PB: predicated region body
PF: predicated region fallthrough
CT: control target
= control target key end

     0   :  { %v1078_v2 = vmov 0   ;;  %s1390_s0 = inlined_call_operand.vmem [shape: s32[128,1], index: 0, kind: input, shape index: {}]   ;;  %s1391_s1 = inlined_call_operand.vmem [shape: s32[128,1], index: 1, kind: input, shape index: {}]   ;;  %s1392_s2 = inlined_call_operand.vmem [shape: f32[64,128], index: 2, kind: input, shape index: {}]   ;;  %s1393_s3 = inlined_call_operand.vmem [shape: f32[48,128], index: 3, kind: input, shape index: {}]   ;;  %s1394_s4 = inlined_call_operand.hbm [shape: f32[1,128], index: 4, kind: output, shape index: {}]  }
   0x1   :  { %v21_v0 = vld [vmem:[%s1390_s0 + $0x8] sm:$0xff]  ;;  %v20_v1 = vld [vmem:[%s1390_s0] sm:$0xff]  ;;  %1053 = vset.pattern.permute.xlu1 %v1078_v2  ;;  %1052 = vset.pattern.permute.xlu0 %v1078_v2  ;;  %v134_v5 = vld [vmem:[%s1391_s1 + $0x10] sm:$0xff] }
   0x2   :  { %40 = vperm.xlu1 %1053, %v21_v0   ;;  %37 = vperm.xlu0 %1052, %v20_v1   ;;  %v133_v3 = vld [vmem:[%s1391_s1 + $0x8] sm:$0xff]  ;;  %v132_v4 = vld [vmem:[%s1391_s1] sm:$0xff]  ;;  %v22_v6 = vld [vmem:[%s1390_s0 + $0x10] sm:$0xff] }
   0x3   :  { %v135_v7 = vld [vmem:[%s1391_s1 + $0x18] sm:$0xff]  ;;  %v244_v9 = vld [vmem:[%s1392_s2] sm:$0xff]  ;;  %v245_v10 = vld [vmem:[%s1392_s2 + $0x8] sm:$0xff] }
   0x4   :  { %v23_v8 = vld [vmem:[%s1390_s0 + $0x18] sm:$0xff]  ;;  %v246_v11 = vld [vmem:[%s1392_s2 + $0x10] sm:$0xff]  ;;  %v1021_v13 = vpack.c.bf16 %v245_v10, %v244_v9  ;;  %v446_v14 = vld [vmem:[%s1393_s3] sm:$0xff] }
   0x5   :  { %v247_v12 = vld [vmem:[%s1392_s2 + $0x18] sm:$0xff]  ;;  %v248_v16 = vld [vmem:[%s1392_s2 + $0x20] sm:$0xff]  ;;  %v447_v17 = vld [vmem:[%s1393_s3 + $0x8] sm:$0xff] }
   0x6   :  { %152 = vperm.xlu1 %1053, %v133_v3   ;;  %149 = vperm.xlu0 %1052, %v132_v4   ;;  %v1025_v15 = vpack.c.bf16 %v247_v12, %v246_v11  ;;  %v249_v18 = vld [vmem:[%s1392_s2 + $0x28] sm:$0xff]  ;;  %v1037_v19 = vpack.c.bf16 %v447_v17, %v446_v14  ;;  %v448_v20 = vld [vmem:[%s1393_s3 + $0x10] sm:$0xff]  ;;  %v449_v21 = vld [vmem:[%s1393_s3 + $0x18] sm:$0xff] }
   0x7   :  { %v136_v22 = vld [vmem:[%s1391_s1 + $0x20] sm:$0xff]  ;;  %1022 = vmatprep.subr.bf16.mxu0 %v1021_v13  ;;  %v1041_v24 = vpack.c.bf16 %v449_v21, %v448_v20 }
   0x8   :  { %v24_v23 = vld [vmem:[%s1390_s0 + $0x20] sm:$0xff] }
   0xa   :  { %155 = vperm.xlu1 %1053, %v134_v5   ;;  %43 = vperm.xlu0 %1052, %v22_v6  }
   0xe   :  { %158 = vperm.xlu1 %1053, %v135_v7   ;;  %46 = vperm.xlu0 %1052, %v23_v8  }
   0xf   :  { %9 = vsyncpa [#allocation3], 0  ;;  %1024 = vmatpush3.bf16.msra.mxu0 %v1021_v13  ;;  %1038 = vmatprep.subr.bf16.mxu1 %v1037_v19  ;;  %v450_v25 = vld [vmem:[%s1393_s3 + $0x20] sm:$0xff]  ;;  %v451_v26 = vld [vmem:[%s1393_s3 + $0x28] sm:$0xff]  ;;  %v1029_v27 = vpack.c.bf16 %v249_v18, %v248_v16  ;;  %v18_v54 = vlaneseq  ;;  %vm252_vm0 = vcmask 523264   ;;  %v1079_v58 = vmov 0.0  }
  0x10   :  { %1026 = vmatprep.subr.bf16.mxu0 %v1025_v15  ;;  %1040 = vmatpush3.bf16.msra.mxu1 %v1037_v19  ;;  %v250_v28 = vld [vmem:[%s1392_s2 + $0x30] sm:$0xff]  ;;  %v251_v29 = vld [vmem:[%s1392_s2 + $0x38] sm:$0xff]  ;;  %v137_v30 = vld [vmem:[%s1391_s1 + $0x28] sm:$0xff]  ;;  %v1045_v32 = vpack.c.bf16 %v451_v26, %v450_v25  ;;  %vm452_vm3 = vcmask 392192  }
  0x11   :  { %v25_v31 = vld [vmem:[%s1390_s0 + $0x28] sm:$0xff]  ;;  %1042 = vmatprep.subr.bf16.mxu1 %v1041_v24  ;;  %v1033_v33 = vpack.c.bf16 %v251_v29, %v250_v28  ;;  %v138_v34 = vld [vmem:[%s1391_s1 + $0x30] sm:$0xff]  ;;  %v139_v36 = vld [vmem:[%s1391_s1 + $0x38] sm:$0xff]  ;;  %v1245_v55 = vand.u32 127, %v18_v54 }
  0x12   :  { %161 = vperm.xlu1 %1053, %v136_v22   ;;  %49 = vperm.xlu0 %1052, %v24_v23   ;;  %v26_v35 = vld [vmem:[%s1390_s0 + $0x30] sm:$0xff]  ;;  %v27_v37 = vld [vmem:[%s1390_s0 + $0x38] sm:$0xff]  ;;  %v140_v38 = vld [vmem:[%s1391_s1 + $0x40] sm:$0xff] }
  0x13   :  { %1028 = vmatpush3.bf16.msra.mxu0 %v1025_v15  ;;  %v28_v39 = vld [vmem:[%s1390_s0 + $0x40] sm:$0xff]  ;;  %v141_v40 = vld [vmem:[%s1391_s1 + $0x48] sm:$0xff]  ;;  %v142_v42 = vld [vmem:[%s1391_s1 + $0x50] sm:$0xff] }
  0x14   :  { %1030 = vmatprep.subr.bf16.mxu0 %v1029_v27  ;;  %1044 = vmatpush3.bf16.msra.mxu1 %v1041_v24  ;;  %v29_v41 = vld [vmem:[%s1390_s0 + $0x48] sm:$0xff]  ;;  %v30_v43 = vld [vmem:[%s1390_s0 + $0x50] sm:$0xff]  ;;  %v143_v44 = vld [vmem:[%s1391_s1 + $0x58] sm:$0xff] }
  0x15   :  { %1046 = vmatprep.subr.bf16.mxu1 %v1045_v32  ;;  %v31_v45 = vld [vmem:[%s1390_s0 + $0x58] sm:$0xff]  ;;  %v144_v46 = vld [vmem:[%s1391_s1 + $0x60] sm:$0xff]  ;;  %v145_v48 = vld [vmem:[%s1391_s1 + $0x68] sm:$0xff] }
  0x16   :  { %164 = vperm.xlu1 %1053, %v137_v30   ;;  %52 = vperm.xlu0 %1052, %v25_v31   ;;  %v32_v47 = vld [vmem:[%s1390_s0 + $0x60] sm:$0xff]  ;;  %v33_v49 = vld [vmem:[%s1390_s0 + $0x68] sm:$0xff]  ;;  %v146_v50 = vld [vmem:[%s1391_s1 + $0x70] sm:$0xff] }
  0x17   :  { %1032 = vmatpush3.bf16.msra.mxu0 %v1029_v27  ;;  %v34_v51 = vld [vmem:[%s1390_s0 + $0x70] sm:$0xff]  ;;  %v147_v52 = vld [vmem:[%s1391_s1 + $0x78] sm:$0xff] }
  0x18   :  { %1034 = vmatprep.subr.bf16.mxu0 %v1033_v33  ;;  %1048 = vmatpush3.bf16.msra.mxu1 %v1045_v32  ;;  %v35_v53 = vld [vmem:[%s1390_s0 + $0x78] sm:$0xff]  ;;  %s1080_s0 = smov [#allocation2]  }
  0x19   :  { %s827_s1 = sshll.u32 %s1080_s0, 4  ;;  %s828_s1 = int_to_ptr.vmem [resolvable:$true] %s827_s1 }
  0x1a   :  { %167 = vperm.xlu1 %1053, %v138_v34   ;;  %55 = vperm.xlu0 %1052, %v26_v35   ;;  %s1054_s25 = scalar_lea.vmem %s828_s1, 16  ;;  %s1058_s26 = scalar_lea.vmem %s828_s1, 32 }
  0x1b   :  { %1036 = vmatpush3.bf16.msra.mxu0 %v1033_v33  ;;  %p1055_p0 = scmp.ne.s32.totalorder %s828_s1, %s1054_s25  ;;  %p1059_p1 = scmp.lt.s32.totalorder %s828_s1, %s828_s1 }
  0x1c   :  { %p1060_p2 = scmp.lt.s32.totalorder %s1058_s26, %s1054_s25 }
  0x1e   :  { %170 = vperm.xlu1 %1053, %v139_v36   ;;  %58 = vperm.xlu0 %1052, %v27_v37   ;;  %p1061_p3 = por %p1060_p2, %p1059_p1 }
  0x20   :  { %p1062_p4 = pnand %p1061_p3, %p1055_p0 }
  0x22   :  { %173 = vperm.xlu1 %1053, %v140_v38   ;;  %61 = vperm.xlu0 %1052, %v28_v39  }
  0x26   :  { %176 = vperm.xlu1 %1053, %v141_v40   ;;  %64 = vperm.xlu0 %1052, %v29_v41  }
  0x2a   :  { %179 = vperm.xlu1 %1053, %v142_v42   ;;  %67 = vperm.xlu0 %1052, %v30_v43  }
  0x2e   :  { %182 = vperm.xlu1 %1053, %v143_v44   ;;  %70 = vperm.xlu0 %1052, %v31_v45  }
  0x32   :  { %185 = vperm.xlu1 %1053, %v144_v46   ;;  %73 = vperm.xlu0 %1052, %v32_v47  }
  0x36   :  { %188 = vperm.xlu1 %1053, %v145_v48   ;;  %76 = vperm.xlu0 %1052, %v33_v49  }
  0x3a   :  { %191 = vperm.xlu1 %1053, %v146_v50   ;;  %79 = vperm.xlu0 %1052, %v34_v51  }
  0x3e   :  { %194 = vperm.xlu1 %1053, %v147_v52   ;;  %82 = vperm.xlu0 %1052, %v35_v53  }
  0x81   :  { %v41_v56 = vpop.permute.xlu1 %40  ;;  %v38_v57 = vpop.permute.xlu0 %37 }
  0x82   :  { %vm85_vm1 = vcmp.eq.s32.totalorder %v1245_v55, %v41_v56  ;;  %vm84_vm2 = vcmp.eq.s32.totalorder %v1245_v55, %v38_v57 }
  0x83   :  { %v836_v59 = vsel %vm85_vm1, 1.0, %v1079_v58  ;;  %v835_v60 = vsel %vm84_vm2, 1.0, %v1079_v58 }
  0x84   :  { %961 = vmatprep.mubr.msk.f32.mxu0 %vm252_vm0, %v835_v60 }
  0x85   :  { %v153_v61 = vpop.permute.xlu1 %152  ;;  %v150_v62 = vpop.permute.xlu0 %149  ;;  %962 = vmatmul.mubr.msk.f32.vlgmr.msra.gmra.mrb[0].mxu0 %vm252_vm0, %v836_v59 }
  0x86   :  { %vm197_vm4 = vcmp.eq.s32.totalorder %v1245_v55, %v153_v61  ;;  %vm196_vm5 = vcmp.eq.s32.totalorder %v1245_v55, %v150_v62 }
  0x87   :  { %v852_v63 = vsel %vm197_vm4, 1.0, %v1079_v58  ;;  %v851_v0 = vsel %vm196_vm5, 1.0, %v1079_v58 }
  0x88   :  { %997 = vmatprep.mubr.msk.f32.mxu1 %vm452_vm3, %v851_v0 }
  0x89   :  { %v156_v1 = vpop.permute.xlu1 %155  ;;  %v44_v2 = vpop.permute.xlu0 %43  ;;  %998 = vmatmul.mubr.msk.f32.vlgmr.msra.gmra.mrb[0].mxu1 %vm452_vm3, %v852_v63 }
  0x8a   :  { %vm198_vm6 = vcmp.eq.s32.totalorder %v1245_v55, %v156_v1  ;;  %vm86_vm7 = vcmp.eq.s32.totalorder %v1245_v55, %v44_v2 }
  0x8b   :  { %v853_v3 = vsel %vm198_vm6, 1.0, %v1079_v58  ;;  %v837_v4 = vsel %vm86_vm7, 1.0, %v1079_v58 }
  0x8c   :  { %964 = vmatprep.mubr.msk.f32.mxu0 %vm252_vm0, %v837_v4  ;;  %1000 = vmatprep.mubr.msk.f32.mxu1 %vm452_vm3, %v853_v3 }
  0x8d   :  { %v159_v5 = vpop.permute.xlu1 %158  ;;  %v47_v6 = vpop.permute.xlu0 %46 }
  0x8e   :  { %vm199_vm8 = vcmp.eq.s32.totalorder %v1245_v55, %v159_v5  ;;  %vm87_vm9 = vcmp.eq.s32.totalorder %v1245_v55, %v47_v6 }
  0x8f   :  { %v854_v7 = vsel %vm199_vm8, 1.0, %v1079_v58  ;;  %v838_v8 = vsel %vm87_vm9, 1.0, %v1079_v58 }
  0x90   :  { %965 = vmatmul.mubr.msk.f32.gmra.mrb[2].mxu0 %vm252_vm0, %v838_v8  ;;  %1001 = vmatmul.mubr.msk.f32.gmra.mrb[2].mxu1 %vm452_vm3, %v854_v7 }
  0x91   :  { %v162_v9 = vpop.permute.xlu1 %161  ;;  %v50_v10 = vpop.permute.xlu0 %49 }
  0x92   :  { %vm200_vm10 = vcmp.eq.s32.totalorder %v1245_v55, %v162_v9  ;;  %vm88_vm11 = vcmp.eq.s32.totalorder %v1245_v55, %v50_v10 }
  0x93   :  { %v855_v11 = vsel %vm200_vm10, 1.0, %v1079_v58  ;;  %v839_v12 = vsel %vm88_vm11, 1.0, %v1079_v58 }
  0x94   :  { %967 = vmatprep.mubr.msk.f32.mxu0 %vm252_vm0, %v839_v12  ;;  %1003 = vmatprep.mubr.msk.f32.mxu1 %vm452_vm3, %v855_v11 }
  0x95   :  { %v165_v13 = vpop.permute.xlu1 %164  ;;  %v53_v14 = vpop.permute.xlu0 %52 }
  0x96   :  { %vm201_vm12 = vcmp.eq.s32.totalorder %v1245_v55, %v165_v13  ;;  %vm89_vm13 = vcmp.eq.s32.totalorder %v1245_v55, %v53_v14 }
  0x97   :  { %v856_v15 = vsel %vm201_vm12, 1.0, %v1079_v58  ;;  %v840_v16 = vsel %vm89_vm13, 1.0, %v1079_v58 }
  0x98   :  { %968 = vmatmul.mubr.msk.f32.gmra.mrb[4].mxu0 %vm252_vm0, %v840_v16  ;;  %1004 = vmatmul.mubr.msk.f32.gmra.mrb[4].mxu1 %vm452_vm3, %v856_v15 }
  0x99   :  { %v168_v17 = vpop.permute.xlu1 %167  ;;  %v56_v18 = vpop.permute.xlu0 %55 }
  0x9a   :  { %vm202_vm14 = vcmp.eq.s32.totalorder %v1245_v55, %v168_v17  ;;  %vm90_vm15 = vcmp.eq.s32.totalorder %v1245_v55, %v56_v18 }
  0x9b   :  { %v857_v19 = vsel %vm202_vm14, 1.0, %v1079_v58  ;;  %v841_v20 = vsel %vm90_vm15, 1.0, %v1079_v58 }
  0x9c   :  { %970 = vmatprep.mubr.msk.f32.mxu0 %vm252_vm0, %v841_v20  ;;  %1006 = vmatprep.mubr.msk.f32.mxu1 %vm452_vm3, %v857_v19 }
  0x9d   :  { %v171_v21 = vpop.permute.xlu1 %170  ;;  %v59_v22 = vpop.permute.xlu0 %58 }
  0x9e   :  { %vm203_vm1 = vcmp.eq.s32.totalorder %v1245_v55, %v171_v21  ;;  %vm91_vm2 = vcmp.eq.s32.totalorder %v1245_v55, %v59_v22 }
  0x9f   :  { %v858_v23 = vsel %vm203_vm1, 1.0, %v1079_v58  ;;  %v842_v24 = vsel %vm91_vm2, 1.0, %v1079_v58 }
  0xa0   :  { %971 = vmatmul.mubr.msk.f32.gmra.mrb[6].mxu0 %vm252_vm0, %v842_v24  ;;  %1007 = vmatmul.mubr.msk.f32.gmra.mrb[6].mxu1 %vm452_vm3, %v858_v23 }
  0xa1   :  { %v174_v25 = vpop.permute.xlu1 %173  ;;  %v62_v26 = vpop.permute.xlu0 %61 }
  0xa2   :  { %vm204_vm4 = vcmp.eq.s32.totalorder %v1245_v55, %v174_v25  ;;  %vm92_vm5 = vcmp.eq.s32.totalorder %v1245_v55, %v62_v26 }
  0xa3   :  { %v859_v27 = vsel %vm204_vm4, 1.0, %v1079_v58  ;;  %v843_v28 = vsel %vm92_vm5, 1.0, %v1079_v58 }
  0xa4   :  { %973 = vmatprep.mubr.msk.f32.mxu0 %vm252_vm0, %v843_v28  ;;  %1009 = vmatprep.mubr.msk.f32.mxu1 %vm452_vm3, %v859_v27 }
  0xa5   :  { %v177_v29 = vpop.permute.xlu1 %176  ;;  %v65_v30 = vpop.permute.xlu0 %64 }
  0xa6   :  { %vm205_vm6 = vcmp.eq.s32.totalorder %v1245_v55, %v177_v29  ;;  %vm93_vm7 = vcmp.eq.s32.totalorder %v1245_v55, %v65_v30 }
  0xa7   :  { %v860_v31 = vsel %vm205_vm6, 1.0, %v1079_v58  ;;  %v844_v32 = vsel %vm93_vm7, 1.0, %v1079_v58  ;;  %vm733_vm6 = vcmask 261312   ;;  %vm740_vm7 = vcmask 326912  }
  0xa8   :  { %974 = vmatmul.mubr.msk.f32.gmra.mrb[8].mxu0 %vm252_vm0, %v844_v32  ;;  %1010 = vmatmul.mubr.msk.f32.gmra.mrb[8].mxu1 %vm452_vm3, %v860_v31 }
  0xa9   :  { %v180_v33 = vpop.permute.xlu1 %179  ;;  %v68_v34 = vpop.permute.xlu0 %67 }
  0xaa   :  { %vm206_vm8 = vcmp.eq.s32.totalorder %v1245_v55, %v180_v33  ;;  %vm94_vm9 = vcmp.eq.s32.totalorder %v1245_v55, %v68_v34 }
  0xab   :  { %v861_v35 = vsel %vm206_vm8, 1.0, %v1079_v58  ;;  %v845_v36 = vsel %vm94_vm9, 1.0, %v1079_v58  ;;  %vm747_vm8 = vcmask 392512   ;;  %vm754_vm9 = vcmask 458112  }
  0xac   :  { %976 = vmatprep.mubr.msk.f32.mxu0 %vm252_vm0, %v845_v36  ;;  %1012 = vmatprep.mubr.msk.f32.mxu1 %vm452_vm3, %v861_v35 }
  0xad   :  { %v183_v37 = vpop.permute.xlu1 %182  ;;  %v71_v38 = vpop.permute.xlu0 %70 }
  0xae   :  { %vm207_vm10 = vcmp.eq.s32.totalorder %v1245_v55, %v183_v37  ;;  %vm95_vm11 = vcmp.eq.s32.totalorder %v1245_v55, %v71_v38 }
  0xaf   :  { %v862_v39 = vsel %vm207_vm10, 1.0, %v1079_v58  ;;  %v846_v40 = vsel %vm95_vm11, 1.0, %v1079_v58  ;;  %vm761_vm10 = vcmask 523712   ;;  %vm768_vm11 = vcmask 589312  }
  0xb0   :  { %977 = vmatmul.mubr.msk.f32.gmra.mrb[10].mxu0 %vm252_vm0, %v846_v40  ;;  %1013 = vmatmul.mubr.msk.f32.gmra.mrb[10].mxu1 %vm452_vm3, %v862_v39 }
  0xb1   :  { %v186_v41 = vpop.permute.xlu1 %185  ;;  %v74_v42 = vpop.permute.xlu0 %73 }
  0xb2   :  { %vm208_vm12 = vcmp.eq.s32.totalorder %v1245_v55, %v186_v41  ;;  %vm96_vm13 = vcmp.eq.s32.totalorder %v1245_v55, %v74_v42 }
  0xb3   :  { %v863_v43 = vsel %vm208_vm12, 1.0, %v1079_v58  ;;  %v847_v44 = vsel %vm96_vm13, 1.0, %v1079_v58  ;;  %vm775_vm12 = vcmask 654912   ;;  %vm782_vm13 = vcmask 720512  }
  0xb4   :  { %979 = vmatprep.mubr.msk.f32.mxu0 %vm252_vm0, %v847_v44  ;;  %1015 = vmatprep.mubr.msk.f32.mxu1 %vm452_vm3, %v863_v43  ;;  %v1344_v44 = vshrl.u32 %v18_v54, 7 }
  0xb5   :  { %v189_v45 = vpop.permute.xlu1 %188  ;;  %v77_v46 = vpop.permute.xlu0 %76 }
  0xb6   :  { %vm209_vm14 = vcmp.eq.s32.totalorder %v1245_v55, %v189_v45  ;;  %vm97_vm15 = vcmp.eq.s32.totalorder %v1245_v55, %v77_v46  ;;  %v714_v45 = vadd.s32 4294967288, %v1245_v55 }
  0xb7   :  { %v864_v47 = vsel %vm209_vm14, 1.0, %v1079_v58  ;;  %v848_v48 = vsel %vm97_vm15, 1.0, %v1079_v58  ;;  %vm789_vm14 = vcmask 786112   ;;  %vm796_vm15 = vcmask 851712  }
  0xb8   :  { %980 = vmatmul.mubr.msk.f32.gmra.mrb[12].mxu0 %vm252_vm0, %v848_v48  ;;  %1016 = vmatmul.mubr.msk.f32.gmra.mrb[12].mxu1 %vm452_vm3, %v864_v47  ;;  %v721_v47 = vadd.s32 4294967280, %v1245_v55  ;;  %v717_v48 = vsub.s32 %v714_v45, %v1344_v44 }
  0xb9   :  { %v192_v49 = vpop.permute.xlu1 %191  ;;  %v80_v50 = vpop.permute.xlu0 %79 }
  0xba   :  { %vm210_vm1 = vcmp.eq.s32.totalorder %v1245_v55, %v192_v49  ;;  %vm98_vm2 = vcmp.eq.s32.totalorder %v1245_v55, %v80_v50  ;;  %v712_v49 = vsub.s32 %v1245_v55, %v1344_v44 }
  0xbb   :  { %v865_v51 = vsel %vm210_vm1, 1.0, %v1079_v58  ;;  %v849_v52 = vsel %vm98_vm2, 1.0, %v1079_v58  ;;  %vm803_vm1 = vcmask 917312   ;;  %vm810_vm2 = vcmask 982912  }
  0xbc   :  { %982 = vmatprep.mubr.msk.f32.mxu0 %vm252_vm0, %v849_v52  ;;  %1018 = vmatprep.mubr.msk.f32.mxu1 %vm452_vm3, %v865_v51  ;;  %v724_v51 = vsub.s32 %v721_v47, %v1344_v44  ;;  %v735_v52 = vadd.s32 4294967264, %v1245_v55 }
  0xbd   :  { %v195_v53 = vpop.permute.xlu1 %194  ;;  %v83_v56 = vpop.permute.xlu0 %82 }
  0xbe   :  { %vm211_vm4 = vcmp.eq.s32.totalorder %v1245_v55, %v195_v53  ;;  %vm99_vm5 = vcmp.eq.s32.totalorder %v1245_v55, %v83_v56  ;;  %v728_v53 = vadd.s32 4294967272, %v1245_v55 }
  0xbf   :  { %v866_v57 = vsel %vm211_vm4, 1.0, %v1079_v58  ;;  %v850_v59 = vsel %vm99_vm5, 1.0, %v1079_v58  ;;  %vm817_vm4 = vcmask 1048512  }
  0xc0   :  { %983 = vmatmul.mubr.msk.f32.gmra.mrb[14].mxu0 %vm252_vm0, %v850_v59  ;;  %1019 = vmatmul.mubr.msk.f32.gmra.mrb[14].mxu1 %vm452_vm3, %v866_v57  ;;  %vm719_vm0 = vcmask 130112   ;;  %vm726_vm3 = vcmask 195712  }
 0x158   :  { %v963_v60 = vpop.f32.mrb[0].mxu0 }
 0x159   :  { %v367_v61 = vpop.f32.mrb[1].mxu0 }
 0x15c   :  { %v999_v62 = vpop.f32.mrb[0].mxu1 }
 0x15d   :  { %v647_v63 = vmul.f32 %v999_v62, %v963_v60  ;;  %v567_v0 = vpop.f32.mrb[1].mxu1  ;;  %v738_v60 = vsub.s32 %v735_v52, %v1344_v44  ;;  %v731_v62 = vsub.s32 %v728_v53, %v1344_v44 }
 0x15e   :  { %v646_v1 = vmul.f32 %v567_v0, %v367_v61  ;;  %v749_v61 = vadd.s32 4294967248, %v1245_v55 }
 0x15f   :  { %664 = vadd.xlane.f32.xlu1 %v647_v63  ;;  %v742_v63 = vadd.s32 4294967256, %v1245_v55 }
 0x160   :  { %662 = vadd.xlane.f32.xlu0 %v646_v1 }
 0x163   :  { %v966_v2 = vpop.f32.mrb[2].mxu0  ;;  %v1002_v3 = vpop.f32.mrb[2].mxu1 }
 0x164   :  { %v649_v4 = vmul.f32 %v1002_v3, %v966_v2  ;;  %v377_v5 = vpop.f32.mrb[3].mxu0  ;;  %v577_v6 = vpop.f32.mrb[3].mxu1 }
 0x165   :  { %v648_v7 = vmul.f32 %v577_v6, %v377_v5  ;;  %v752_v5 = vsub.s32 %v749_v61, %v1344_v44  ;;  %v763_v6 = vadd.s32 4294967232, %v1245_v55 }
 0x166   :  { %668 = vadd.xlane.f32.xlu0 %v649_v4 }
 0x16a   :  { %666 = vadd.xlane.f32.xlu0 %v648_v7 }
 0x16b   :  { %v969_v58 = vpop.f32.mrb[4].mxu0  ;;  %v1005_v8 = vpop.f32.mrb[4].mxu1 }
 0x16c   :  { %v651_v9 = vmul.f32 %v1005_v8, %v969_v58  ;;  %v387_v10 = vpop.f32.mrb[5].mxu0  ;;  %v587_v11 = vpop.f32.mrb[5].mxu1  ;;  %v745_v58 = vsub.s32 %v742_v63, %v1344_v44  ;;  %v756_v8 = vadd.s32 4294967240, %v1245_v55 }
 0x16d   :  { %v650_v12 = vmul.f32 %v587_v11, %v387_v10 }
 0x16e   :  { %672 = vadd.xlane.f32.xlu0 %v651_v9 }
 0x16f   :  { %670 = vadd.xlane.f32.xlu1 %v650_v12 }
 0x173   :  { %v972_v13 = vpop.f32.mrb[6].mxu0  ;;  %v1008_v14 = vpop.f32.mrb[6].mxu1 }
 0x174   :  { %v653_v15 = vmul.f32 %v1008_v14, %v972_v13  ;;  %v397_v16 = vpop.f32.mrb[7].mxu0  ;;  %v597_v17 = vpop.f32.mrb[7].mxu1  ;;  %v766_v14 = vsub.s32 %v763_v6, %v1344_v44 }
 0x175   :  { %v652_v18 = vmul.f32 %v597_v17, %v397_v16  ;;  %v759_v17 = vsub.s32 %v756_v8, %v1344_v44 }
 0x176   :  { %676 = vadd.xlane.f32.xlu0 %v653_v15  ;;  %v777_v15 = vadd.s32 4294967216, %v1245_v55 }
 0x177   :  { %674 = vadd.xlane.f32.xlu1 %v652_v18  ;;  %v770_v18 = vadd.s32 4294967224, %v1245_v55 }
 0x17b   :  { %v975_v19 = vpop.f32.mrb[8].mxu0  ;;  %v1011_v20 = vpop.f32.mrb[8].mxu1 }
 0x17c   :  { %v655_v21 = vmul.f32 %v1011_v20, %v975_v19  ;;  %v407_v22 = vpop.f32.mrb[9].mxu0  ;;  %v607_v23 = vpop.f32.mrb[9].mxu1 }
 0x17d   :  { %v654_v24 = vmul.f32 %v607_v23, %v407_v22 }
 0x17e   :  { %680 = vadd.xlane.f32.xlu0 %v655_v21 }
 0x17f   :  { %678 = vadd.xlane.f32.xlu1 %v654_v24  ;;  %v780_v24 = vsub.s32 %v777_v15, %v1344_v44 }
 0x183   :  { %v978_v25 = vpop.f32.mrb[10].mxu0  ;;  %v1014_v26 = vpop.f32.mrb[10].mxu1 }
 0x184   :  { %v657_v27 = vmul.f32 %v1014_v26, %v978_v25  ;;  %v417_v28 = vpop.f32.mrb[11].mxu0  ;;  %v617_v29 = vpop.f32.mrb[11].mxu1  ;;  %v791_v25 = vadd.s32 4294967200, %v1245_v55 }
 0x185   :  { %v656_v30 = vmul.f32 %v617_v29, %v417_v28  ;;  %v784_v28 = vadd.s32 4294967208, %v1245_v55 }
 0x186   :  { %684 = vadd.xlane.f32.xlu0 %v657_v27  ;;  %v773_v27 = vsub.s32 %v770_v18, %v1344_v44 }
 0x187   :  { %682 = vadd.xlane.f32.xlu1 %v656_v30 }
 0x18b   :  { %v981_v31 = vpop.f32.mrb[12].mxu0  ;;  %v1017_v32 = vpop.f32.mrb[12].mxu1 }
 0x18c   :  { %v659_v33 = vmul.f32 %v1017_v32, %v981_v31  ;;  %v427_v34 = vpop.f32.mrb[13].mxu0  ;;  %v627_v35 = vpop.f32.mrb[13].mxu1 }
 0x18d   :  { %v658_v36 = vmul.f32 %v627_v35, %v427_v34  ;;  %v794_v34 = vsub.s32 %v791_v25, %v1344_v44 }
 0x18e   :  { %688 = vadd.xlane.f32.xlu0 %v659_v33 }
 0x18f   :  { %686 = vadd.xlane.f32.xlu1 %v658_v36  ;;  %v787_v36 = vsub.s32 %v784_v28, %v1344_v44 }
 0x193   :  { %v984_v37 = vpop.f32.mrb[14].mxu0  ;;  %v1020_v38 = vpop.f32.mrb[14].mxu1 }
 0x194   :  { %v661_v39 = vmul.f32 %v1020_v38, %v984_v37  ;;  %v437_v40 = vpop.f32.mrb[15].mxu0  ;;  %v637_v41 = vpop.f32.mrb[15].mxu1  ;;  %v798_v37 = vadd.s32 4294967192, %v1245_v55 }
 0x195   :  { %v660_v42 = vmul.f32 %v637_v41, %v437_v40  ;;  %v812_v41 = vadd.s32 4294967176, %v1245_v55 }
 0x196   :  { %692 = vadd.xlane.f32.xlu0 %v661_v39  ;;  %v805_v39 = vadd.s32 4294967184, %v1245_v55  ;;  %v801_v47 = vsub.s32 %v798_v37, %v1344_v44 }
 0x197   :  { %690 = vadd.xlane.f32.xlu1 %v660_v42 }
 0x1ec   :  { %v665_v50 = vpop.xlane.xlu1 %664 }
 0x1ed   :  { %v663_v43 = vpop.xlane.xlu0 %662  ;;  %v718_v54 = vrot.slane %v665_v50, %v717_v48  ;;  %v808_v48 = vsub.s32 %v805_v39, %v1344_v44  ;;  %v815_v50 = vsub.s32 %v812_v41, %v1344_v44 }
 0x1ee   :  { %v713_v57 = vrot.slane %v663_v43, %v712_v49 }
 0x1f0   :  { %v720_v1 = vsel %vm719_vm0, %v718_v54, %v713_v57 }
 0x1f3   :  { %v669_v46 = vpop.xlane.xlu0 %668 }
 0x1f4   :  { %v732_v7 = vrot.slane %v669_v46, %v731_v62 }
 0x1f7   :  { %v667_v56 = vpop.xlane.xlu0 %666 }
 0x1f8   :  { %v725_v59 = vrot.slane %v667_v56, %v724_v51 }
 0x1fa   :  { %v727_v2 = vsel %vm726_vm3, %v725_v59, %v720_v1 }
 0x1fb   :  { %v673_v3 = vpop.xlane.xlu0 %672  ;;  %v734_v10 = vsel %vm733_vm6, %v732_v7, %v727_v2 }
 0x1fc   :  { %v671_v0 = vpop.xlane.xlu1 %670  ;;  %v746_v16 = vrot.slane %v673_v3, %v745_v58 }
 0x1fd   :  { %v739_v4 = vrot.slane %v671_v0, %v738_v60 }
 0x1ff   :  { %v741_v11 = vsel %vm740_vm7, %v739_v4, %v734_v10 }
 0x200   :  { %v748_v20 = vsel %vm747_vm8, %v746_v16, %v741_v11 }
 0x203   :  { %v677_v12 = vpop.xlane.xlu0 %676 }
 0x204   :  { %v675_v9 = vpop.xlane.xlu1 %674  ;;  %v760_v26 = vrot.slane %v677_v12, %v759_v17 }
 0x205   :  { %v753_v13 = vrot.slane %v675_v9, %v752_v5 }
 0x207   :  { %v755_v21 = vsel %vm754_vm9, %v753_v13, %v748_v20 }
 0x208   :  { %v762_v30 = vsel %vm761_vm10, %v760_v26, %v755_v21 }
 0x20b   :  { %v681_v22 = vpop.xlane.xlu0 %680 }
 0x20c   :  { %v679_v19 = vpop.xlane.xlu1 %678  ;;  %v774_v35 = vrot.slane %v681_v22, %v773_v27 }
 0x20d   :  { %v767_v23 = vrot.slane %v679_v19, %v766_v14 }
 0x20f   :  { %v769_v31 = vsel %vm768_vm11, %v767_v23, %v762_v30 }
 0x210   :  { %v776_v40 = vsel %vm775_vm12, %v774_v35, %v769_v31 }
 0x213   :  { %v685_v32 = vpop.xlane.xlu0 %684 }
 0x214   :  { %v683_v29 = vpop.xlane.xlu1 %682  ;;  %v788_v46 = vrot.slane %v685_v32, %v787_v36 }
 0x215   :  { %v781_v33 = vrot.slane %v683_v29, %v780_v24 }
 0x217   :  { %v783_v42 = vsel %vm782_vm13, %v781_v33, %v776_v40 }
 0x218   :  { %v790_v49 = vsel %vm789_vm14, %v788_v46, %v783_v42 }
 0x21b   :  { %v689_v43 = vpop.xlane.xlu0 %688 }
 0x21c   :  { %v687_v38 = vpop.xlane.xlu1 %686  ;;  %v802_v53 = vrot.slane %v689_v43, %v801_v47 }
 0x21d   :  { %v795_v45 = vrot.slane %v687_v38, %v794_v34 }
 0x21f   :  { %v797_v51 = vsel %vm796_vm15, %v795_v45, %v790_v49 }
 0x220   :  { %v804_v57 = vsel %vm803_vm1, %v802_v53, %v797_v51 }
 0x223   :  { %v693_v52 = vpop.xlane.xlu0 %692 }
 0x224   :  { %v691_v56 = vpop.xlane.xlu1 %690  ;;  %v816_v54 = vrot.slane %v693_v52, %v815_v50 }
 0x225   :  { %v809_v55 = vrot.slane %v691_v56, %v808_v48 }
 0x227   :  { %v811_v59 = vsel %vm810_vm2, %v809_v55, %v804_v57 }
 0x228   :  { %v818_v60 = vsel %vm817_vm4, %v816_v54, %v811_v59 }
 0x229   :  { %820 = vst [vmem:[#allocation2] sm:$0x1] %v818_v60 }
 0x22a   :  { %1065 = shalt.err (!%p1062_p4)
}
 0x22b   :  { %s1066_s29 = scalar_lea.hbm %s1394_s4, 16 }
 0x22c   :  { %p1067_p5 = scmp.ne.s32.totalorder %s1394_s4, %s1066_s29  ;;  %p1070_p6 = scmp.lt.u32.totalorder %s1066_s29, %s1394_s4 }
 0x22e   :  { %p1072_p7 = pnand %p1070_p6, %p1067_p5 }
 0x230   :  { %1075 = shalt.err (!%p1072_p7)
}
 0x231   :  { %830 = dma.vmem_to_hbm [thread:$0]  %s828_s1, 16, %s1394_s4, [#allocation3]  }
 0x232   :  { %1076 = dma.done.wait [#allocation3], 16  }
 0x233   :  { %1077 = vsyncadd [#allocation3], 4294967280 }
 0x234   :  { %834 = vsyncpa [#allocation3], 1 }

</bundles_post_ra>
